<compile_context>
chip_gen: v6e
topology: v6e:2x2x1
jax: 0.10.0
libtpu: 0.0.40
codegen_flags: <defaults>
</compile_context>

<pallas_src>
import functools

import jax
import jax.numpy as jnp
from jax.experimental import pallas as pl
from jax.experimental.pallas import tpu as pltpu


OUT_W = 8  # packed head width: col 0 = q1, col 1 = q2, rest zero.

# Constant-index weight slabs never re-fetch, so one VMEM buffer is enough.
# If pipeline_mode=pl.Buffered(1) is rejected, flip once and retry.
_SINGLE_BUFFER_WEIGHTS = [True]


# ----------------------------------------------------------------------------
# Kernel
# ----------------------------------------------------------------------------
def llq_kernel(fuse_l2, H,
               task_ref,                     # scalar prefetch (SMEM); head pick is in index_maps
               s_ref, a_ref,                 # (bt, ni), (bt, na)
               w1s_ref, w1a_ref, b1_ref,     # (ni, 2H), (na, 2H), (1, 2H)
               w2_ref, b2_ref,               # (2H, 2H) block-diag OR (2, H, H); (1, 2H)
               w3_ref, b3_ref,               # (2H, OUT_W), (1, OUT_W)  (task axis squeezed)
               out_ref):                     # (bt, OUT_W)
    del task_ref

    cd = w1s_ref.dtype                       # MXU input dtype (bf16 default, f32 optional)
    s = s_ref[...].astype(cd)
    a = a_ref[...].astype(cd)

    # Fused layer 1 (both heads): xu @ [W1 || W4] == s @ W1s + a @ W1a  (f32 epilogue)
    h = (jnp.dot(s, w1s_ref[...], preferred_element_type=jnp.float32)
         + jnp.dot(a, w1a_ref[...], preferred_element_type=jnp.float32)
         + b1_ref[...])
    h = jnp.maximum(h, 0.0)
    hc = h.astype(cd)

    if fuse_l2:
        # Small H: single fused block-diag(W2, W5) matmul on the stacked activation.
        g = jnp.dot(hc, w2_ref[...], preferred_element_type=jnp.float32) + b2_ref[...]
        g = jnp.maximum(g, 0.0).astype(cd)
        q = jnp.dot(g, w3_ref[...], preferred_element_type=jnp.float32)
    else:
        # Large H: two HxH dots -- skip the structural-zero half of the MXU work.
        gl = (jnp.dot(hc[:, :H], w2_ref[0], preferred_element_type=jnp.float32)
              + b2_ref[:, :H])
        gr = (jnp.dot(hc[:, H:], w2_ref[1], preferred_element_type=jnp.float32)
              + b2_ref[:, H:])
        gl = jnp.maximum(gl, 0.0).astype(cd)
        gr = jnp.maximum(gr, 0.0).astype(cd)
        q = (jnp.dot(gl, w3_ref[:H, :], preferred_element_type=jnp.float32)
             + jnp.dot(gr, w3_ref[H:, :], preferred_element_type=jnp.float32))

    out_ref[...] = (q + b3_ref[...]).astype(out_ref.dtype)


# ----------------------------------------------------------------------------
# Wrapper
# ----------------------------------------------------------------------------
def _batch_tiling(B):
    """Pick (tile_rows, padded_B)."""
    if B < 256:
        return B, B                       # one full block: no pad copy, one launch
    bt = 128 if B < 2048 else 512         # >=2 grid steps => both v7x TCs get work
    return bt, pl.cdiv(B, bt) * bt


def _weight_spec(shape, index_map):
    if _SINGLE_BUFFER_WEIGHTS[0]:
        return pl.BlockSpec(shape, index_map, pipeline_mode=pl.Buffered(1))
    return pl.BlockSpec(shape, index_map)


def _llq_forward_impl(state, action, task_id, packed):
    w1s, w1a, b1f, w2f, b2f, w3f, b3f = packed
    B, ni = state.shape
    na = action.shape[1]
    nt, H2, out_w = w3f.shape            # (num_tasks, 2H, OUT_W)
    H = H2 // 2
    fuse_l2 = (w2f.ndim == 2)

    bt, Bp = _batch_tiling(B)
    if Bp != B:
        state = jnp.pad(state, ((0, Bp - B), (0, 0)))
        action = jnp.pad(action, ((0, Bp - B), (0, 0)))

    # Clamp task_id so an out-of-range value can never become an OOB block index.
    task = jnp.clip(jnp.asarray(task_id, jnp.int32), 0, nt - 1).reshape((1,))

    kernel = functools.partial(llq_kernel, fuse_l2, H)
    w2_map = (lambda i, t: (0, 0)) if fuse_l2 else (lambda i, t: (0, 0, 0))

    weight_bytes = (sum(int(x.nbytes) for x in (w1s, w1a, b1f, w2f, b2f))
                    + int(w3f.nbytes) // nt + int(b3f.nbytes) // nt)
    flops_l2 = 2 * H2 * H2 if fuse_l2 else 4 * H * H
    cost = pl.CostEstimate(
        flops=int(Bp * (2 * (ni + na) * H2 + flops_l2 + 2 * H2 * out_w)),
        transcendentals=0,
        bytes_accessed=int(state.nbytes + action.nbytes
                           + Bp * out_w * 4 + weight_bytes))

    act_bytes = bt * (ni + na) * 4 + bt * out_w * 4          # per-step in/out blocks
    vmem_limit = (2 * weight_bytes + 2 * act_bytes            # buffers (worst case 2x)
                  + 8 * bt * H2 * 4 + (4 << 20))              # intermediates + headroom
    vmem_limit = int(min(max(vmem_limit, 16 << 20), 96 << 20))

    out = pl.pallas_call(
        kernel,
        out_shape=jax.ShapeDtypeStruct((Bp, out_w), jnp.float32),
        grid_spec=pltpu.PrefetchScalarGridSpec(
            num_scalar_prefetch=1,
            grid=(Bp // bt,),
            in_specs=[
                pl.BlockSpec((bt, ni), lambda i, t: (i, 0)),      # state tile
                pl.BlockSpec((bt, na), lambda i, t: (i, 0)),      # action tile
                _weight_spec(w1s.shape, lambda i, t: (0, 0)),     # resident weights
                _weight_spec(w1a.shape, lambda i, t: (0, 0)),
                _weight_spec(b1f.shape, lambda i, t: (0, 0)),
                _weight_spec(w2f.shape, w2_map),
                _weight_spec(b2f.shape, lambda i, t: (0, 0)),
                _weight_spec((pl.Squeezed(), H2, out_w), lambda i, t: (t[0], 0, 0)),
                _weight_spec((pl.Squeezed(), 1, out_w), lambda i, t: (t[0], 0, 0)),
            ],
            out_specs=pl.BlockSpec((bt, out_w), lambda i, t: (i, 0)),
        ),
        compiler_params=pltpu.CompilerParams(
            dimension_semantics=("parallel",),
            vmem_limit_bytes=vmem_limit),
        cost_estimate=cost,
    )(task, state, action, w1s, w1a, b1f, w2f, b2f, w3f, b3f)

    q = out[:B, :2]
    return q[:, 0:1], q[:, 1:2]


def llq_forward(state, action, task_id, packed):
    """Twin-Q forward. Returns (q1, q2), each (B, 1) float32."""
    try:
        return _llq_forward_impl(state, action, task_id, packed)
    except Exception:
        if not _SINGLE_BUFFER_WEIGHTS[0]:
            raise
        _SINGLE_BUFFER_WEIGHTS[0] = False   # retry with default double-buffered weights
        return _llq_forward_impl(state, action, task_id, packed)


# ----------------------------------------------------------------------------
# Parameter init (PyTorch-equivalent) and fused packing
# ----------------------------------------------------------------------------
def xavier_uniform(key, fan_in, fan_out, gain=1.0):
    limit = gain * jnp.sqrt(6.0 / (fan_in + fan_out))
    return jax.random.uniform(key, (fan_in, fan_out),
                              minval=-limit, maxval=limit, dtype=jnp.float32)


def linear_bias(key, fan_in, fan_out):
    # PyTorch nn.Linear default bias init: U(-1/sqrt(fan_in), 1/sqrt(fan_in))
    bound = 1.0 / jnp.sqrt(jnp.float32(fan_in))
    return jax.random.uniform(key, (fan_out,),
                              minval=-bound, maxval=bound, dtype=jnp.float32)


def init_params(key, num_inputs, num_actions, hidden_dim, num_tasks):
    D, H = num_inputs + num_actions, hidden_dim
    keys = iter(jax.random.split(key, 8 + 4 * num_tasks))
    p = {}
    p["w1"], p["b1"] = xavier_uniform(next(keys), D, H), linear_bias(next(keys), D, H)
    p["w2"], p["b2"] = xavier_uniform(next(keys), H, H), linear_bias(next(keys), H, H)
    p["w3"] = jnp.stack([xavier_uniform(next(keys), H, 1) for _ in range(num_tasks)])
    p["b3"] = jnp.stack([linear_bias(next(keys), H, 1) for _ in range(num_tasks)])
    p["w4"], p["b4"] = xavier_uniform(next(keys), D, H), linear_bias(next(keys), D, H)
    p["w5"], p["b5"] = xavier_uniform(next(keys), H, H), linear_bias(next(keys), H, H)
    p["w6"] = jnp.stack([xavier_uniform(next(keys), H, 1) for _ in range(num_tasks)])
    p["b6"] = jnp.stack([linear_bias(next(keys), H, 1) for _ in range(num_tasks)])
    return p


def pack_params(params, num_inputs, compute_dtype=jnp.bfloat16, out_w=OUT_W):
    """Fuse the twin heads into MXU/DMA-friendly slabs (once, outside the hot path).

    bf16 is the default MXU-input dtype on every TPU generation (f32 matmul
    decomposes into multiple bf16 passes); biases stay f32 for the epilogue.
    """
    w1, b1 = params["w1"], params["b1"]
    w2, b2 = params["w2"], params["b2"]
    w3, b3 = params["w3"], params["b3"]
    w4, b4 = params["w4"], params["b4"]
    w5, b5 = params["w5"], params["b5"]
    w6, b6 = params["w6"], params["b6"]
    H = w2.shape[0]
    nt = w3.shape[0]

    w1f = jnp.concatenate([w1, w4], axis=1)                     # (D, 2H)
    w1s = w1f[:num_inputs].astype(compute_dtype)                # (ni, 2H)
    w1a = w1f[num_inputs:].astype(compute_dtype)                # (na, 2H)
    b1f = jnp.concatenate([b1, b4])[None, :].astype(jnp.float32)

    if H <= 128:
        # Small hidden dim: fused block-diag (per-matmul overhead dominates).
        w2f = jnp.zeros((2 * H, 2 * H), jnp.float32)
        w2f = w2f.at[:H, :H].set(w2).at[H:, H:].set(w5).astype(compute_dtype)
    else:
        # Large hidden dim: keep the two HxH blocks separate.
        w2f = jnp.stack([w2, w5]).astype(compute_dtype)          # (2, H, H)
    b2f = jnp.concatenate([b2, b5])[None, :].astype(jnp.float32)

    w3f = jnp.zeros((nt, 2 * H, out_w), jnp.float32)
    w3f = w3f.at[:, :H, 0].set(w3[:, :, 0]).at[:, H:, 1].set(w6[:, :, 0])
    w3f = w3f.astype(compute_dtype)
    b3f = jnp.zeros((nt, 1, out_w), jnp.float32)
    b3f = b3f.at[:, 0, 0].set(b3[:, 0]).at[:, 0, 1].set(b6[:, 0])

    return (w1s, w1a, b1f, w2f, b2f, w3f, b3f)


# ----------------------------------------------------------------------------
# Pure-JAX reference (mirrors the PyTorch forward)
# ----------------------------------------------------------------------------
def reference_forward(state, action, task_id, params):
    xu = jnp.concatenate([state, action], axis=1)
    h1 = jax.nn.relu(xu @ params["w1"] + params["b1"])
    h1 = jax.nn.relu(h1 @ params["w2"] + params["b2"])
    q1 = h1 @ params["w3"][task_id] + params["b3"][task_id]
    h2 = jax.nn.relu(xu @ params["w4"] + params["b4"])
    h2 = jax.nn.relu(h2 @ params["w5"] + params["b5"])
    q2 = h2 @ params["w6"][task_id] + params["b6"][task_id]
    return q1, q2


if __name__ == "__main__":
    def run_case(ni, na, H, nt, B, task_id, key, f32_tol):
        ks, ka, kp = jax.random.split(key, 3)
        state = jax.random.normal(ks, (B, ni), dtype=jnp.float32)
        action = jax.random.normal(ka, (B, na), dtype=jnp.float32)
        params = init_params(kp, ni, na, H, nt)
        r1, r2 = reference_forward(state, action, task_id, params)

        # f32 MXU-input path: near-exact check against the reference.
        q1, q2 = llq_forward(state, action, task_id,
                             pack_params(params, ni, compute_dtype=jnp.float32))
        jax.block_until_ready((q1, q2))
        assert q1.shape == (B, 1) and q2.shape == (B, 1)
        assert jnp.allclose(q1, r1, atol=f32_tol, rtol=f32_tol)
        assert jnp.allclose(q2, r2, atol=f32_tol, rtol=f32_tol)

        # bf16 MXU-input path (default packing): loose sanity check.
        q1b, q2b = llq_forward(state, action, task_id, pack_params(params, ni))
        jax.block_until_ready((q1b, q2b))
        assert jnp.allclose(q1b, r1, atol=1e-1) and jnp.allclose(q2b, r2, atol=1e-1)

    key = jax.random.PRNGKey(0)
    k1, k2 = jax.random.split(key)
    # Small config: fused block-diagonal layer 2, single full batch block.
    run_case(ni=8, na=4, H=32, nt=3, B=8, task_id=1, key=k1, f32_tol=1e-4)
    # Larger-hidden config: split layer 2 (no structural-zero MXU work),
    # multi-step batch grid with a padded ragged tail.
    run_case(ni=16, na=8, H=256, nt=2, B=300, task_id=0, key=k2, f32_tol=2e-3)

    print("KERNEL_OK")
</pallas_src>

<mosaic_0001>
module attributes {stable_mosaic.version = 11 : i64} {
  func.func @llq_kernel(%arg0: i32, %arg1: memref<1xi32, #tpu.memory_space<smem>>, %arg2: memref<8x8xf32, #tpu.memory_space<vmem>>, %arg3: memref<8x4xf32, #tpu.memory_space<vmem>>, %arg4: memref<8x64xf32, #tpu.memory_space<vmem>>, %arg5: memref<4x64xf32, #tpu.memory_space<vmem>>, %arg6: memref<1x64xf32, #tpu.memory_space<vmem>>, %arg7: memref<64x64xf32, #tpu.memory_space<vmem>>, %arg8: memref<1x64xf32, #tpu.memory_space<vmem>>, %arg9: memref<1x64x8xf32, #tpu.memory_space<vmem>>, %arg10: memref<1x1x8xf32, #tpu.memory_space<vmem>>, %arg11: memref<8x8xf32, #tpu.memory_space<vmem>>) attributes {dimension_semantics = [#tpu.dimension_semantics<parallel>], iteration_bounds = array<i64: 1>, scalar_prefetch = 1 : i64, scratch_operands = 0 : i64, tpu.core_type = #tpu.core_type<tc>, window_params = [{transform_indices = @transform_0, window_bounds = array<i64: 8, 8>}, {transform_indices = @transform_1, window_bounds = array<i64: 8, 4>}, {pipeline_mode = #tpu.pipeline_mode<synchronous>, transform_indices = @transform_2, window_bounds = array<i64: 8, 64>}, {pipeline_mode = #tpu.pipeline_mode<synchronous>, transform_indices = @transform_3, window_bounds = array<i64: 4, 64>}, {pipeline_mode = #tpu.pipeline_mode<synchronous>, transform_indices = @transform_4, window_bounds = array<i64: 1, 64>}, {pipeline_mode = #tpu.pipeline_mode<synchronous>, transform_indices = @transform_5, window_bounds = array<i64: 64, 64>}, {pipeline_mode = #tpu.pipeline_mode<synchronous>, transform_indices = @transform_6, window_bounds = array<i64: 1, 64>}, {pipeline_mode = #tpu.pipeline_mode<synchronous>, transform_indices = @transform_7, window_bounds = array<i64: 1, 64, 8>}, {pipeline_mode = #tpu.pipeline_mode<synchronous>, transform_indices = @transform_8, window_bounds = array<i64: 1, 1, 8>}, {transform_indices = @transform_9, window_bounds = array<i64: 8, 8>}]} {
    %c0 = arith.constant 0 : index
    %c0_0 = arith.constant 0 : index
    %0 = vector.load %arg2[%c0, %c0_0] : memref<8x8xf32, #tpu.memory_space<vmem>>, vector<8x8xf32>
    %c0_1 = arith.constant 0 : index
    %c0_2 = arith.constant 0 : index
    %1 = vector.load %arg3[%c0_1, %c0_2] : memref<8x4xf32, #tpu.memory_space<vmem>>, vector<8x4xf32>
    %c0_3 = arith.constant 0 : index
    %c0_4 = arith.constant 0 : index
    %2 = vector.load %arg4[%c0_3, %c0_4] : memref<8x64xf32, #tpu.memory_space<vmem>>, vector<8x64xf32>
    %cst = arith.constant dense<0.000000e+00> : vector<8x64xf32>
    %3 = tpu.matmul %0, %2, %cst {dimension_numbers = #tpu.dot_dimension_numbers<[1], [0], [0], [1], [0, 0, 1, 1], [], []>} : vector<8x8xf32>, vector<8x64xf32>, vector<8x64xf32> -> vector<8x64xf32>
    %c0_5 = arith.constant 0 : index
    %c0_6 = arith.constant 0 : index
    %4 = vector.load %arg5[%c0_5, %c0_6] : memref<4x64xf32, #tpu.memory_space<vmem>>, vector<4x64xf32>
    %cst_7 = arith.constant dense<0.000000e+00> : vector<8x64xf32>
    %5 = tpu.matmul %1, %4, %cst_7 {dimension_numbers = #tpu.dot_dimension_numbers<[1], [0], [0], [1], [0, 0, 1, 1], [], []>} : vector<8x4xf32>, vector<4x64xf32>, vector<8x64xf32> -> vector<8x64xf32>
    %6 = arith.addf %3, %5 : vector<8x64xf32>
    %c0_8 = arith.constant 0 : index
    %c0_9 = arith.constant 0 : index
    %7 = vector.load %arg6[%c0_8, %c0_9] : memref<1x64xf32, #tpu.memory_space<vmem>>, vector<1x64xf32>
    %8 = vector.broadcast %7 : vector<1x64xf32> to vector<8x64xf32>
    %9 = arith.addf %6, %8 : vector<8x64xf32>
    %cst_10 = arith.constant 0.000000e+00 : f32
    %10 = vector.broadcast %cst_10 : f32 to vector<8x64xf32>
    %11 = arith.maximumf %9, %10 : vector<8x64xf32>
    %c0_11 = arith.constant 0 : index
    %c0_12 = arith.constant 0 : index
    %12 = vector.load %arg7[%c0_11, %c0_12] : memref<64x64xf32, #tpu.memory_space<vmem>>, vector<64x64xf32>
    %cst_13 = arith.constant dense<0.000000e+00> : vector<8x64xf32>
    %13 = tpu.matmul %11, %12, %cst_13 {dimension_numbers = #tpu.dot_dimension_numbers<[1], [0], [0], [1], [0, 0, 1, 1], [], []>} : vector<8x64xf32>, vector<64x64xf32>, vector<8x64xf32> -> vector<8x64xf32>
    %c0_14 = arith.constant 0 : index
    %c0_15 = arith.constant 0 : index
    %14 = vector.load %arg8[%c0_14, %c0_15] : memref<1x64xf32, #tpu.memory_space<vmem>>, vector<1x64xf32>
    %15 = vector.broadcast %14 : vector<1x64xf32> to vector<8x64xf32>
    %16 = arith.addf %13, %15 : vector<8x64xf32>
    %cst_16 = arith.constant 0.000000e+00 : f32
    %17 = vector.broadcast %cst_16 : f32 to vector<8x64xf32>
    %18 = arith.maximumf %16, %17 : vector<8x64xf32>
    %c0_17 = arith.constant 0 : index
    %c0_18 = arith.constant 0 : index
    %c0_19 = arith.constant 0 : index
    %19 = vector.load %arg9[%c0_17, %c0_18, %c0_19] : memref<1x64x8xf32, #tpu.memory_space<vmem>>, vector<1x64x8xf32>
    %20 = vector.shape_cast %19 : vector<1x64x8xf32> to vector<64x8xf32>
    %cst_20 = arith.constant dense<0.000000e+00> : vector<8x8xf32>
    %21 = tpu.matmul %18, %20, %cst_20 {dimension_numbers = #tpu.dot_dimension_numbers<[1], [0], [0], [1], [0, 0, 1, 1], [], []>} : vector<8x64xf32>, vector<64x8xf32>, vector<8x8xf32> -> vector<8x8xf32>
    %c0_21 = arith.constant 0 : index
    %c0_22 = arith.constant 0 : index
    %c0_23 = arith.constant 0 : index
    %22 = vector.load %arg10[%c0_21, %c0_22, %c0_23] : memref<1x1x8xf32, #tpu.memory_space<vmem>>, vector<1x1x8xf32>
    %23 = vector.shape_cast %22 : vector<1x1x8xf32> to vector<1x8xf32>
    %24 = vector.broadcast %23 : vector<1x8xf32> to vector<8x8xf32>
    %25 = arith.addf %21, %24 : vector<8x8xf32>
    %c0_24 = arith.constant 0 : index
    %c0_25 = arith.constant 0 : index
    %26 = vector.load %arg11[%c0_24, %c0_25] : memref<8x8xf32, #tpu.memory_space<vmem>>, vector<8x8xf32>
    tpu.vector_store %arg11[%c0_24, %c0_25], %25 {strides = array<i32>} : memref<8x8xf32, #tpu.memory_space<vmem>>, vector<8x8xf32>,
    return
  }
  func.func @transform_0(%arg0: i32, %arg1: memref<1xi32, #tpu.memory_space<smem>>) -> (i32, i32) {
    %c0_i32 = arith.constant 0 : i32
    %c0_i32_0 = arith.constant 0 : i32
    return %arg0, %c0_i32 : i32, i32
  }
  func.func @transform_1(%arg0: i32, %arg1: memref<1xi32, #tpu.memory_space<smem>>) -> (i32, i32) {
    %c0_i32 = arith.constant 0 : i32
    %c0_i32_0 = arith.constant 0 : i32
    return %arg0, %c0_i32 : i32, i32
  }
  func.func @transform_2(%arg0: i32, %arg1: memref<1xi32, #tpu.memory_space<smem>>) -> (i32, i32) {
    %c0_i32 = arith.constant 0 : i32
    %c0_i32_0 = arith.constant 0 : i32
    %c0_i32_1 = arith.constant 0 : i32
    return %c0_i32, %c0_i32_0 : i32, i32
  }
  func.func @transform_3(%arg0: i32, %arg1: memref<1xi32, #tpu.memory_space<smem>>) -> (i32, i32) {
    %c0_i32 = arith.constant 0 : i32
    %c0_i32_0 = arith.constant 0 : i32
    %c0_i32_1 = arith.constant 0 : i32
    return %c0_i32, %c0_i32_0 : i32, i32
  }
  func.func @transform_4(%arg0: i32, %arg1: memref<1xi32, #tpu.memory_space<smem>>) -> (i32, i32) {
    %c0_i32 = arith.constant 0 : i32
    %c0_i32_0 = arith.constant 0 : i32
    %c0_i32_1 = arith.constant 0 : i32
    return %c0_i32, %c0_i32_0 : i32, i32
  }
  func.func @transform_5(%arg0: i32, %arg1: memref<1xi32, #tpu.memory_space<smem>>) -> (i32, i32) {
    %c0_i32 = arith.constant 0 : i32
    %c0_i32_0 = arith.constant 0 : i32
    %c0_i32_1 = arith.constant 0 : i32
    return %c0_i32, %c0_i32_0 : i32, i32
  }
  func.func @transform_6(%arg0: i32, %arg1: memref<1xi32, #tpu.memory_space<smem>>) -> (i32, i32) {
    %c0_i32 = arith.constant 0 : i32
    %c0_i32_0 = arith.constant 0 : i32
    %c0_i32_1 = arith.constant 0 : i32
    return %c0_i32, %c0_i32_0 : i32, i32
  }
  func.func @transform_7(%arg0: i32, %arg1: memref<1xi32, #tpu.memory_space<smem>>) -> (i32, i32, i32) {
    %c0 = arith.constant 0 : index
    %0 = memref.load %arg1[%c0] : memref<1xi32, #tpu.memory_space<smem>>
    %c0_i32 = arith.constant 0 : i32
    %c0_i32_0 = arith.constant 0 : i32
    %c0_i32_1 = arith.constant 0 : i32
    return %0, %c0_i32, %c0_i32_0 : i32, i32, i32
  }
  func.func @transform_8(%arg0: i32, %arg1: memref<1xi32, #tpu.memory_space<smem>>) -> (i32, i32, i32) {
    %c0 = arith.constant 0 : index
    %0 = memref.load %arg1[%c0] : memref<1xi32, #tpu.memory_space<smem>>
    %c0_i32 = arith.constant 0 : i32
    %c0_i32_0 = arith.constant 0 : i32
    %c0_i32_1 = arith.constant 0 : i32
    return %0, %c0_i32, %c0_i32_0 : i32, i32, i32
  }
  func.func @transform_9(%arg0: i32, %arg1: memref<1xi32, #tpu.memory_space<smem>>) -> (i32, i32) {
    %c0_i32 = arith.constant 0 : i32
    %c0_i32_0 = arith.constant 0 : i32
    return %arg0, %c0_i32 : i32, i32
  }
}

module attributes {stable_mosaic.version = 11 : i64} {
  func.func @llq_kernel(%arg0: i32, %arg1: memref<1xi32, #tpu.memory_space<smem>>, %arg2: memref<8x8xf32, #tpu.memory_space<vmem>>, %arg3: memref<8x4xf32, #tpu.memory_space<vmem>>, %arg4: memref<8x64xf32, #tpu.memory_space<vmem>>, %arg5: memref<4x64xf32, #tpu.memory_space<vmem>>, %arg6: memref<1x64xf32, #tpu.memory_space<vmem>>, %arg7: memref<64x64xf32, #tpu.memory_space<vmem>>, %arg8: memref<1x64xf32, #tpu.memory_space<vmem>>, %arg9: memref<1x64x8xf32, #tpu.memory_space<vmem>>, %arg10: memref<1x1x8xf32, #tpu.memory_space<vmem>>, %arg11: memref<8x8xf32, #tpu.memory_space<vmem>>) attributes {dimension_semantics = [#tpu.dimension_semantics<parallel>], iteration_bounds = array<i64: 1>, scalar_prefetch = 1 : i64, scratch_operands = 0 : i64, tpu.core_type = #tpu.core_type<tc>, window_params = [{transform_indices = @transform_0, window_bounds = array<i64: 8, 8>}, {transform_indices = @transform_1, window_bounds = array<i64: 8, 4>}, {pipeline_mode = #tpu.pipeline_mode<synchronous>, transform_indices = @transform_2, window_bounds = array<i64: 8, 64>}, {pipeline_mode = #tpu.pipeline_mode<synchronous>, transform_indices = @transform_3, window_bounds = array<i64: 4, 64>}, {pipeline_mode = #tpu.pipeline_mode<synchronous>, transform_indices = @transform_4, window_bounds = array<i64: 1, 64>}, {pipeline_mode = #tpu.pipeline_mode<synchronous>, transform_indices = @transform_5, window_bounds = array<i64: 64, 64>}, {pipeline_mode = #tpu.pipeline_mode<synchronous>, transform_indices = @transform_6, window_bounds = array<i64: 1, 64>}, {transform_indices = @transform_7, window_bounds = array<i64: 1, 64, 8>}, {transform_indices = @transform_8, window_bounds = array<i64: 1, 1, 8>}, {transform_indices = @transform_9, window_bounds = array<i64: 8, 8>}]} {
    %c0 = arith.constant 0 : index
    %c0_0 = arith.constant 0 : index
    %0 = vector.load %arg2[%c0, %c0_0] : memref<8x8xf32, #tpu.memory_space<vmem>>, vector<8x8xf32>
    %c0_1 = arith.constant 0 : index
    %c0_2 = arith.constant 0 : index
    %1 = vector.load %arg3[%c0_1, %c0_2] : memref<8x4xf32, #tpu.memory_space<vmem>>, vector<8x4xf32>
    %c0_3 = arith.constant 0 : index
    %c0_4 = arith.constant 0 : index
    %2 = vector.load %arg4[%c0_3, %c0_4] : memref<8x64xf32, #tpu.memory_space<vmem>>, vector<8x64xf32>
    %cst = arith.constant dense<0.000000e+00> : vector<8x64xf32>
    %3 = tpu.matmul %0, %2, %cst {dimension_numbers = #tpu.dot_dimension_numbers<[1], [0], [0], [1], [0, 0, 1, 1], [], []>} : vector<8x8xf32>, vector<8x64xf32>, vector<8x64xf32> -> vector<8x64xf32>
    %c0_5 = arith.constant 0 : index
    %c0_6 = arith.constant 0 : index
    %4 = vector.load %arg5[%c0_5, %c0_6] : memref<4x64xf32, #tpu.memory_space<vmem>>, vector<4x64xf32>
    %cst_7 = arith.constant dense<0.000000e+00> : vector<8x64xf32>
    %5 = tpu.matmul %1, %4, %cst_7 {dimension_numbers = #tpu.dot_dimension_numbers<[1], [0], [0], [1], [0, 0, 1, 1], [], []>} : vector<8x4xf32>, vector<4x64xf32>, vector<8x64xf32> -> vector<8x64xf32>
    %6 = arith.addf %3, %5 : vector<8x64xf32>
    %c0_8 = arith.constant 0 : index
    %c0_9 = arith.constant 0 : index
    %7 = vector.load %arg6[%c0_8, %c0_9] : memref<1x64xf32, #tpu.memory_space<vmem>>, vector<1x64xf32>
    %8 = vector.broadcast %7 : vector<1x64xf32> to vector<8x64xf32>
    %9 = arith.addf %6, %8 : vector<8x64xf32>
    %cst_10 = arith.constant 0.000000e+00 : f32
    %10 = vector.broadcast %cst_10 : f32 to vector<8x64xf32>
    %11 = arith.maximumf %9, %10 : vector<8x64xf32>
    %c0_11 = arith.constant 0 : index
    %c0_12 = arith.constant 0 : index
    %12 = vector.load %arg7[%c0_11, %c0_12] : memref<64x64xf32, #tpu.memory_space<vmem>>, vector<64x64xf32>
    %cst_13 = arith.constant dense<0.000000e+00> : vector<8x64xf32>
    %13 = tpu.matmul %11, %12, %cst_13 {dimension_numbers = #tpu.dot_dimension_numbers<[1], [0], [0], [1], [0, 0, 1, 1], [], []>} : vector<8x64xf32>, vector<64x64xf32>, vector<8x64xf32> -> vector<8x64xf32>
    %c0_14 = arith.constant 0 : index
    %c0_15 = arith.constant 0 : index
    %14 = vector.load %arg8[%c0_14, %c0_15] : memref<1x64xf32, #tpu.memory_space<vmem>>, vector<1x64xf32>
    %15 = vector.broadcast %14 : vector<1x64xf32> to vector<8x64xf32>
    %16 = arith.addf %13, %15 : vector<8x64xf32>
    %cst_16 = arith.constant 0.000000e+00 : f32
    %17 = vector.broadcast %cst_16 : f32 to vector<8x64xf32>
    %18 = arith.maximumf %16, %17 : vector<8x64xf32>
    %c0_17 = arith.constant 0 : index
    %c0_18 = arith.constant 0 : index
    %c0_19 = arith.constant 0 : index
    %19 = vector.load %arg9[%c0_17, %c0_18, %c0_19] : memref<1x64x8xf32, #tpu.memory_space<vmem>>, vector<1x64x8xf32>
    %20 = vector.shape_cast %19 : vector<1x64x8xf32> to vector<64x8xf32>
    %cst_20 = arith.constant dense<0.000000e+00> : vector<8x8xf32>
    %21 = tpu.matmul %18, %20, %cst_20 {dimension_numbers = #tpu.dot_dimension_numbers<[1], [0], [0], [1], [0, 0, 1, 1], [], []>} : vector<8x64xf32>, vector<64x8xf32>, vector<8x8xf32> -> vector<8x8xf32>
    %c0_21 = arith.constant 0 : index
    %c0_22 = arith.constant 0 : index
    %c0_23 = arith.constant 0 : index
    %22 = vector.load %arg10[%c0_21, %c0_22, %c0_23] : memref<1x1x8xf32, #tpu.memory_space<vmem>>, vector<1x1x8xf32>
    %23 = vector.shape_cast %22 : vector<1x1x8xf32> to vector<1x8xf32>
    %24 = vector.broadcast %23 : vector<1x8xf32> to vector<8x8xf32>
    %25 = arith.addf %21, %24 : vector<8x8xf32>
    %c0_24 = arith.constant 0 : index
    %c0_25 = arith.constant 0 : index
    %26 = vector.load %arg11[%c0_24, %c0_25] : memref<8x8xf32, #tpu.memory_space<vmem>>, vector<8x8xf32>
    tpu.vector_store %arg11[%c0_24, %c0_25], %25 {strides = array<i32>} : memref<8x8xf32, #tpu.memory_space<vmem>>, vector<8x8xf32>,
    return
  }
  func.func @transform_0(%arg0: i32, %arg1: memref<1xi32, #tpu.memory_space<smem>>) -> (i32, i32) {
    %c0_i32 = arith.constant 0 : i32
    %c0_i32_0 = arith.constant 0 : i32
    return %arg0, %c0_i32 : i32, i32
  }
  func.func @transform_1(%arg0: i32, %arg1: memref<1xi32, #tpu.memory_space<smem>>) -> (i32, i32) {
    %c0_i32 = arith.constant 0 : i32
    %c0_i32_0 = arith.constant 0 : i32
    return %arg0, %c0_i32 : i32, i32
  }
  func.func @transform_2(%arg0: i32, %arg1: memref<1xi32, #tpu.memory_space<smem>>) -> (i32, i32) {
    %c0_i32 = arith.constant 0 : i32
    %c0_i32_0 = arith.constant 0 : i32
    %c0_i32_1 = arith.constant 0 : i32
    return %c0_i32, %c0_i32_0 : i32, i32
  }
  func.func @transform_3(%arg0: i32, %arg1: memref<1xi32, #tpu.memory_space<smem>>) -> (i32, i32) {
    %c0_i32 = arith.constant 0 : i32
    %c0_i32_0 = arith.constant 0 : i32
    %c0_i32_1 = arith.constant 0 : i32
    return %c0_i32, %c0_i32_0 : i32, i32
  }
  func.func @transform_4(%arg0: i32, %arg1: memref<1xi32, #tpu.memory_space<smem>>) -> (i32, i32) {
    %c0_i32 = arith.constant 0 : i32
    %c0_i32_0 = arith.constant 0 : i32
    %c0_i32_1 = arith.constant 0 : i32
    return %c0_i32, %c0_i32_0 : i32, i32
  }
  func.func @transform_5(%arg0: i32, %arg1: memref<1xi32, #tpu.memory_space<smem>>) -> (i32, i32) {
    %c0_i32 = arith.constant 0 : i32
    %c0_i32_0 = arith.constant 0 : i32
    %c0_i32_1 = arith.constant 0 : i32
    return %c0_i32, %c0_i32_0 : i32, i32
  }
  func.func @transform_6(%arg0: i32, %arg1: memref<1xi32, #tpu.memory_space<smem>>) -> (i32, i32) {
    %c0_i32 = arith.constant 0 : i32
    %c0_i32_0 = arith.constant 0 : i32
    %c0_i32_1 = arith.constant 0 : i32
    return %c0_i32, %c0_i32_0 : i32, i32
  }
  func.func @transform_7(%arg0: i32, %arg1: memref<1xi32, #tpu.memory_space<smem>>) -> (i32, i32, i32) {
    %c0 = arith.constant 0 : index
    %0 = memref.load %arg1[%c0] : memref<1xi32, #tpu.memory_space<smem>>
    %c0_i32 = arith.constant 0 : i32
    %c0_i32_0 = arith.constant 0 : i32
    %c0_i32_1 = arith.constant 0 : i32
    return %0, %c0_i32, %c0_i32_0 : i32, i32, i32
  }
  func.func @transform_8(%arg0: i32, %arg1: memref<1xi32, #tpu.memory_space<smem>>) -> (i32, i32, i32) {
    %c0 = arith.constant 0 : index
    %0 = memref.load %arg1[%c0] : memref<1xi32, #tpu.memory_space<smem>>
    %c0_i32 = arith.constant 0 : i32
    %c0_i32_0 = arith.constant 0 : i32
    %c0_i32_1 = arith.constant 0 : i32
    return %0, %c0_i32, %c0_i32_0 : i32, i32, i32
  }
  func.func @transform_9(%arg0: i32, %arg1: memref<1xi32, #tpu.memory_space<smem>>) -> (i32, i32) {
    %c0_i32 = arith.constant 0 : i32
    %c0_i32_0 = arith.constant 0 : i32
    return %arg0, %c0_i32 : i32, i32
  }
}

</mosaic_0001>

<bundles_post_ra>
// kernel: tpu_custom_call.1
= control target key start
LH: loop header
LB: loop body
LE: loop exit
PB: predicated region body
PF: predicated region fallthrough
CT: control target
= control target key end

     0   :  { %vm77_vm0 = vcmask 1043456   ;;  %v542_v2 = vmov 0.0   ;;  %vm73_vm1 = vcmask 31744   ;;  %vm151_vm2 = vcmask 64512   ;;  %s697_s0 = inlined_call_operand.<no memory space> [shape: s32[1], index: 0, kind: input, shape index: {}]   ;;  %s698_s1 = inlined_call_operand.vmem [shape: f32[8,8], index: 1, kind: input, shape index: {}]   ;;  %s699_s2 = inlined_call_operand.vmem [shape: f32[8,4], index: 2, kind: input, shape index: {}]   ;;  %s700_s3 = inlined_call_operand.vmem [shape: f32[8,64], index: 3, kind: input, shape index: {}]   ;;  %s701_s4 = inlined_call_operand.vmem [shape: f32[4,64], index: 4, kind: input, shape index: {}]   ;;  %s702_s5 = inlined_call_operand.vmem [shape: f32[1,64], index: 5, kind: input, shape index: {}]   ;;  %s703_s6 = inlined_call_operand.vmem [shape: f32[64,64], index: 6, kind: input, shape index: {}]   ;;  %s704_s7 = inlined_call_operand.vmem [shape: f32[1,64], index: 7, kind: input, shape index: {}]   ;;  %s705_s8 = inlined_call_operand.vmem [shape: f32[3,64,8], index: 8, kind: input, shape index: {}]   ;;  %s706_s9 = inlined_call_operand.vmem [shape: f32[3,1,8], index: 9, kind: input, shape index: {}]   ;;  %s707_s10 = inlined_call_operand.hbm [shape: f32[8,8], index: 10, kind: output, shape index: {}]  }
   0x1   :  { %v72_v0 = vld [vmem:[%s701_s4] sm:$0xf]  ;;  %469 = vmatprep.subr.mxu0 %v542_v2  ;;  %474 = vmatprep.subr.mxu1 %v542_v2  ;;  %vm543_vm3 = vmmov 0   ;;  %v241_v5 = vld [vmem:[%s703_s6 + $0x38] sm:$0xff] }
   0x2   :  { %v71_v1 = vld [vmem:[%s700_s3] sm:$0xff]  ;;  %470 = vmatpush3.msk.msra.mxu0 %vm77_vm0, %v72_v0  ;;  %471 = vmatprep.mubr.msk.f32.mxu0 %vm543_vm3, %v542_v2 }
   0x3   :  { %v70_v3 = vld [vmem:[%s699_s2] sm:$0xff]  ;;  %475 = vmatpush3.msra.mxu1 %v71_v1  ;;  %476 = vmatprep.mubr.msk.f32.mxu1 %vm543_vm3, %v542_v2 }
   0x4   :  { %v69_v4 = vld [vmem:[%s698_s1] sm:$0xff] }
   0x5   :  { %16 = vsyncpa [#allocation5], 0  ;;  %472 = vmatmul.mubr.msk.f32.vlgmr.msra.gmra.mxu0 %vm73_vm1, %v70_v3  ;;  %477 = vmatmul.mubr.msk.f32.vlgmr.msra.gmra.mxu1 %vm151_vm2, %v69_v4  ;;  %v240_v6 = vld [vmem:[%s703_s6 + $0x30] sm:$0xff]  ;;  %v239_v7 = vld [vmem:[%s703_s6 + $0x28] sm:$0xff]  ;;  %p58_p0 = scmp.lt.s32.totalorder %s697_s0, 2  ;;  %vm249_vm4 = vcmask 523264  }
   0x6   :  { %479 = vmatprep.subr.mxu0 %v542_v2  ;;  %495 = vmatprep.mubr.msk.f32.mxu0 %vm543_vm3, %v542_v2  ;;  %v238_v8 = vld [vmem:[%s703_s6 + $0x20] sm:$0xff]  ;;  %v237_v9 = vld [vmem:[%s703_s6 + $0x18] sm:$0xff]  ;;  %v236_v10 = vld [vmem:[%s703_s6 + $0x10] sm:$0xff]  ;;  %s544_s21 = smov [#allocation4]  }
   0x7   :  { %480 = vmatpush3.msra.mxu0 %v241_v5  ;;  %498 = vmatprep.subr.mxu1 %v542_v2  ;;  %v235_v11 = vld [vmem:[%s703_s6 + $0x8] sm:$0xff]  ;;  %v234_v12 = vld [vmem:[%s703_s6] sm:$0xff]  ;;  %s709_s0 = smov (!%p58_p0, %s697_s0), 2  ;;  %s419_s22 = sshll.u32 %s544_s21, 4  ;;  %s420_s22 = int_to_ptr.vmem [resolvable:$true] %s419_s22 }
   0x8   :  { %481 = vmatprep.subr.mxu0 %v542_v2  ;;  %514 = vmatprep.mubr.msk.f32.mxu1 %vm543_vm3, %v542_v2  ;;  %s446_s17 = sshll.u32 %s709_s0, 6  ;;  %v441_v20 = vld [vmem:[%s702_s5] ss:$0 sm:$0xff]  ;;  %s67_s1 = scalar_lea.vmem %s706_s9, %s709_s0 }
   0x9   :  { %482 = vmatpush3.msra.mxu0 %v240_v6  ;;  %s664_s20 = scalar_lea.vmem %s705_s8, %s446_s17  ;;  %v442_v29 = vld [vmem:[%s704_s7] ss:$0 sm:$0xff]  ;;  %s520_s7 = scalar_lea.vmem %s420_s22, 128 }
   0xa   :  { %483 = vmatprep.subr.mxu0 %v542_v2  ;;  %v331_v13 = vld [vmem:[%s664_s20 + $0x38] sm:$0xff]  ;;  %v330_v14 = vld [vmem:[%s664_s20 + $0x30] sm:$0xff]  ;;  %v329_v15 = vld [vmem:[%s664_s20 + $0x28] sm:$0xff]  ;;  %p521_p1 = scmp.ne.s32.totalorder %s420_s22, %s520_s7  ;;  %p525_p2 = scmp.lt.s32.totalorder %s420_s22, %s420_s22 }
   0xb   :  { %484 = vmatpush3.msra.mxu0 %v239_v7  ;;  %499 = vmatpush3.msra.mxu1 %v331_v13  ;;  %v328_v16 = vld [vmem:[%s664_s20 + $0x20] sm:$0xff]  ;;  %v327_v17 = vld [vmem:[%s664_s20 + $0x18] sm:$0xff]  ;;  %v326_v26 = vld [vmem:[%s664_s20 + $0x10] sm:$0xff]  ;;  %p526_p3 = scmp.lt.s32.totalorder %s520_s7, %s520_s7 }
   0xc   :  { %485 = vmatprep.subr.mxu0 %v542_v2  ;;  %500 = vmatprep.subr.mxu1 %v542_v2  ;;  %v325_v27 = vld [vmem:[%s664_s20 + $0x8] sm:$0xff]  ;;  %v324_v28 = vld [vmem:[%s664_s20] sm:$0xff] }
   0xd   :  { %486 = vmatpush3.msra.mxu0 %v238_v8  ;;  %501 = vmatpush3.msra.mxu1 %v330_v14  ;;  %v444_v34 = vld [vmem:[%s67_s1] ss:$0 sm:$0xff]  ;;  %p527_p4 = por %p526_p3, %p525_p2 }
   0xe   :  { %487 = vmatprep.subr.mxu0 %v542_v2  ;;  %502 = vmatprep.subr.mxu1 %v542_v2 }
   0xf   :  { %488 = vmatpush3.msra.mxu0 %v237_v9  ;;  %503 = vmatpush3.msra.mxu1 %v329_v15  ;;  %p528_p5 = pnand %p527_p4, %p521_p1 }
  0x10   :  { %489 = vmatprep.subr.mxu0 %v542_v2  ;;  %504 = vmatprep.subr.mxu1 %v542_v2 }
  0x11   :  { %490 = vmatpush3.msra.mxu0 %v236_v10  ;;  %505 = vmatpush3.msra.mxu1 %v328_v16 }
  0x12   :  { %491 = vmatprep.subr.mxu0 %v542_v2  ;;  %506 = vmatprep.subr.mxu1 %v542_v2 }
  0x13   :  { %492 = vmatpush3.msra.mxu0 %v235_v11  ;;  %507 = vmatpush3.msra.mxu1 %v327_v17 }
  0x14   :  { %493 = vmatprep.subr.mxu0 %v542_v2  ;;  %508 = vmatprep.subr.mxu1 %v542_v2 }
  0x15   :  { %494 = vmatpush3.msra.mxu0 %v234_v12  ;;  %509 = vmatpush3.msra.mxu1 %v326_v26 }
  0x16   :  { %510 = vmatprep.subr.mxu1 %v542_v2 }
  0x17   :  { %511 = vmatpush3.msra.mxu1 %v325_v27 }
  0x18   :  { %512 = vmatprep.subr.mxu1 %v542_v2 }
  0x19   :  { %513 = vmatpush3.msra.mxu1 %v324_v28 }
  0xc5   :  { %v147_v18 = vpop.f32.mrf.mxu0  ;;  %v221_v19 = vpop.f32.mrf.mxu1 }
  0xc6   :  { %v222_v21 = vadd.f32 %v221_v19, %v147_v18 }
  0xc7   :  { %v473_v22 = vpop.f32.mrf.mxu0  ;;  %v478_v23 = vpop.f32.mrf.mxu1 }
  0xc8   :  { %v232_v24 = vadd.f32 %v441_v20, %v222_v21 }
  0xca   :  { %v233_v25 = vmax.f32 %v232_v24, 0.0 }
  0xcc   :  { %496 = vmatmul.mubr.msk.f32.vlgmr.msra.gmra.mxu0 %vm249_vm4, %v233_v25 }
 0x18c   :  { %v319_v30 = vpop.f32.mrf.mxu0 }
 0x18d   :  { %v320_v31 = vadd.f32 %v442_v29, %v319_v30 }
 0x18e   :  { %v497_v32 = vpop.f32.mrf.mxu0 }
 0x18f   :  { %v323_v33 = vmax.f32 %v320_v31, 0.0 }
 0x191   :  { %515 = vmatmul.mubr.msk.f32.vlgmr.msra.gmra.mxu1 %vm249_vm4, %v323_v33 }
 0x251   :  { %v408_v35 = vpop.f32.mrf.mxu1 }
 0x252   :  { %v409_v36 = vadd.f32 %v444_v34, %v408_v35 }
 0x253   :  { %v516_v37 = vpop.f32.mrf.mxu1 }
 0x254   :  { %412 = vst.msk [vmem:[#allocation4] sm:$0xff] %vm151_vm2, %v409_v36 }
 0x255   :  { %531 = shalt.err (!%p528_p5)
}
 0x256   :  { %422 = dma.vmem_to_hbm [thread:$0]  %s420_s22, 128, %s707_s10, [#allocation5]  }
 0x257   :  { %540 = dma.done.wait [#allocation5], 128  }
 0x258   :  { %541 = vsyncadd [#allocation5], 4294967168 }
 0x259   :  { %426 = vsyncpa [#allocation5], 1 }

// kernel: tpu_custom_call.1
= control target key start
LH: loop header
LB: loop body
LE: loop exit
PB: predicated region body
PF: predicated region fallthrough
CT: control target
= control target key end

     0   :  { %vm77_vm0 = vcmask 1043456   ;;  %v542_v2 = vmov 0.0   ;;  %vm73_vm1 = vcmask 31744   ;;  %vm151_vm2 = vcmask 64512   ;;  %s697_s0 = inlined_call_operand.<no memory space> [shape: s32[1], index: 0, kind: input, shape index: {}]   ;;  %s698_s1 = inlined_call_operand.vmem [shape: f32[8,8], index: 1, kind: input, shape index: {}]   ;;  %s699_s2 = inlined_call_operand.vmem [shape: f32[8,4], index: 2, kind: input, shape index: {}]   ;;  %s700_s3 = inlined_call_operand.vmem [shape: f32[8,64], index: 3, kind: input, shape index: {}]   ;;  %s701_s4 = inlined_call_operand.vmem [shape: f32[4,64], index: 4, kind: input, shape index: {}]   ;;  %s702_s5 = inlined_call_operand.vmem [shape: f32[1,64], index: 5, kind: input, shape index: {}]   ;;  %s703_s6 = inlined_call_operand.vmem [shape: f32[64,64], index: 6, kind: input, shape index: {}]   ;;  %s704_s7 = inlined_call_operand.vmem [shape: f32[1,64], index: 7, kind: input, shape index: {}]   ;;  %s705_s8 = inlined_call_operand.vmem [shape: f32[3,64,8], index: 8, kind: input, shape index: {}]   ;;  %s706_s9 = inlined_call_operand.vmem [shape: f32[3,1,8], index: 9, kind: input, shape index: {}]   ;;  %s707_s10 = inlined_call_operand.hbm [shape: f32[8,8], index: 10, kind: output, shape index: {}]  }
   0x1   :  { %v72_v0 = vld [vmem:[%s701_s4] sm:$0xf]  ;;  %469 = vmatprep.subr.mxu0 %v542_v2  ;;  %474 = vmatprep.subr.mxu1 %v542_v2  ;;  %vm543_vm3 = vmmov 0   ;;  %v241_v5 = vld [vmem:[%s703_s6 + $0x38] sm:$0xff] }
   0x2   :  { %v71_v1 = vld [vmem:[%s700_s3] sm:$0xff]  ;;  %470 = vmatpush3.msk.msra.mxu0 %vm77_vm0, %v72_v0  ;;  %471 = vmatprep.mubr.msk.f32.mxu0 %vm543_vm3, %v542_v2 }
   0x3   :  { %v70_v3 = vld [vmem:[%s699_s2] sm:$0xff]  ;;  %475 = vmatpush3.msra.mxu1 %v71_v1  ;;  %476 = vmatprep.mubr.msk.f32.mxu1 %vm543_vm3, %v542_v2 }
   0x4   :  { %v69_v4 = vld [vmem:[%s698_s1] sm:$0xff] }
   0x5   :  { %16 = vsyncpa [#allocation5], 0  ;;  %472 = vmatmul.mubr.msk.f32.vlgmr.msra.gmra.mxu0 %vm73_vm1, %v70_v3  ;;  %477 = vmatmul.mubr.msk.f32.vlgmr.msra.gmra.mxu1 %vm151_vm2, %v69_v4  ;;  %v240_v6 = vld [vmem:[%s703_s6 + $0x30] sm:$0xff]  ;;  %v239_v7 = vld [vmem:[%s703_s6 + $0x28] sm:$0xff]  ;;  %p58_p0 = scmp.lt.s32.totalorder %s697_s0, 2  ;;  %vm249_vm4 = vcmask 523264  }
   0x6   :  { %479 = vmatprep.subr.mxu0 %v542_v2  ;;  %495 = vmatprep.mubr.msk.f32.mxu0 %vm543_vm3, %v542_v2  ;;  %v238_v8 = vld [vmem:[%s703_s6 + $0x20] sm:$0xff]  ;;  %v237_v9 = vld [vmem:[%s703_s6 + $0x18] sm:$0xff]  ;;  %v236_v10 = vld [vmem:[%s703_s6 + $0x10] sm:$0xff]  ;;  %s544_s21 = smov [#allocation4]  }
   0x7   :  { %480 = vmatpush3.msra.mxu0 %v241_v5  ;;  %498 = vmatprep.subr.mxu1 %v542_v2  ;;  %v235_v11 = vld [vmem:[%s703_s6 + $0x8] sm:$0xff]  ;;  %v234_v12 = vld [vmem:[%s703_s6] sm:$0xff]  ;;  %s709_s0 = smov (!%p58_p0, %s697_s0), 2  ;;  %s419_s22 = sshll.u32 %s544_s21, 4  ;;  %s420_s22 = int_to_ptr.vmem [resolvable:$true] %s419_s22 }
   0x8   :  { %481 = vmatprep.subr.mxu0 %v542_v2  ;;  %514 = vmatprep.mubr.msk.f32.mxu1 %vm543_vm3, %v542_v2  ;;  %s446_s17 = sshll.u32 %s709_s0, 6  ;;  %v441_v20 = vld [vmem:[%s702_s5] ss:$0 sm:$0xff]  ;;  %s67_s1 = scalar_lea.vmem %s706_s9, %s709_s0 }
   0x9   :  { %482 = vmatpush3.msra.mxu0 %v240_v6  ;;  %s664_s20 = scalar_lea.vmem %s705_s8, %s446_s17  ;;  %v442_v29 = vld [vmem:[%s704_s7] ss:$0 sm:$0xff]  ;;  %s520_s7 = scalar_lea.vmem %s420_s22, 128 }
   0xa   :  { %483 = vmatprep.subr.mxu0 %v542_v2  ;;  %v331_v13 = vld [vmem:[%s664_s20 + $0x38] sm:$0xff]  ;;  %v330_v14 = vld [vmem:[%s664_s20 + $0x30] sm:$0xff]  ;;  %v329_v15 = vld [vmem:[%s664_s20 + $0x28] sm:$0xff]  ;;  %p521_p1 = scmp.ne.s32.totalorder %s420_s22, %s520_s7  ;;  %p525_p2 = scmp.lt.s32.totalorder %s420_s22, %s420_s22 }
   0xb   :  { %484 = vmatpush3.msra.mxu0 %v239_v7  ;;  %499 = vmatpush3.msra.mxu1 %v331_v13  ;;  %v328_v16 = vld [vmem:[%s664_s20 + $0x20] sm:$0xff]  ;;  %v327_v17 = vld [vmem:[%s664_s20 + $0x18] sm:$0xff]  ;;  %v326_v26 = vld [vmem:[%s664_s20 + $0x10] sm:$0xff]  ;;  %p526_p3 = scmp.lt.s32.totalorder %s520_s7, %s520_s7 }
   0xc   :  { %485 = vmatprep.subr.mxu0 %v542_v2  ;;  %500 = vmatprep.subr.mxu1 %v542_v2  ;;  %v325_v27 = vld [vmem:[%s664_s20 + $0x8] sm:$0xff]  ;;  %v324_v28 = vld [vmem:[%s664_s20] sm:$0xff] }
   0xd   :  { %486 = vmatpush3.msra.mxu0 %v238_v8  ;;  %501 = vmatpush3.msra.mxu1 %v330_v14  ;;  %v444_v34 = vld [vmem:[%s67_s1] ss:$0 sm:$0xff]  ;;  %p527_p4 = por %p526_p3, %p525_p2 }
   0xe   :  { %487 = vmatprep.subr.mxu0 %v542_v2  ;;  %502 = vmatprep.subr.mxu1 %v542_v2 }
   0xf   :  { %488 = vmatpush3.msra.mxu0 %v237_v9  ;;  %503 = vmatpush3.msra.mxu1 %v329_v15  ;;  %p528_p5 = pnand %p527_p4, %p521_p1 }
  0x10   :  { %489 = vmatprep.subr.mxu0 %v542_v2  ;;  %504 = vmatprep.subr.mxu1 %v542_v2 }
  0x11   :  { %490 = vmatpush3.msra.mxu0 %v236_v10  ;;  %505 = vmatpush3.msra.mxu1 %v328_v16 }
  0x12   :  { %491 = vmatprep.subr.mxu0 %v542_v2  ;;  %506 = vmatprep.subr.mxu1 %v542_v2 }
  0x13   :  { %492 = vmatpush3.msra.mxu0 %v235_v11  ;;  %507 = vmatpush3.msra.mxu1 %v327_v17 }
  0x14   :  { %493 = vmatprep.subr.mxu0 %v542_v2  ;;  %508 = vmatprep.subr.mxu1 %v542_v2 }
  0x15   :  { %494 = vmatpush3.msra.mxu0 %v234_v12  ;;  %509 = vmatpush3.msra.mxu1 %v326_v26 }
  0x16   :  { %510 = vmatprep.subr.mxu1 %v542_v2 }
  0x17   :  { %511 = vmatpush3.msra.mxu1 %v325_v27 }
  0x18   :  { %512 = vmatprep.subr.mxu1 %v542_v2 }
  0x19   :  { %513 = vmatpush3.msra.mxu1 %v324_v28 }
  0xc5   :  { %v147_v18 = vpop.f32.mrf.mxu0  ;;  %v221_v19 = vpop.f32.mrf.mxu1 }
  0xc6   :  { %v222_v21 = vadd.f32 %v221_v19, %v147_v18 }
  0xc7   :  { %v473_v22 = vpop.f32.mrf.mxu0  ;;  %v478_v23 = vpop.f32.mrf.mxu1 }
  0xc8   :  { %v232_v24 = vadd.f32 %v441_v20, %v222_v21 }
  0xca   :  { %v233_v25 = vmax.f32 %v232_v24, 0.0 }
  0xcc   :  { %496 = vmatmul.mubr.msk.f32.vlgmr.msra.gmra.mxu0 %vm249_vm4, %v233_v25 }
 0x18c   :  { %v319_v30 = vpop.f32.mrf.mxu0 }
 0x18d   :  { %v320_v31 = vadd.f32 %v442_v29, %v319_v30 }
 0x18e   :  { %v497_v32 = vpop.f32.mrf.mxu0 }
 0x18f   :  { %v323_v33 = vmax.f32 %v320_v31, 0.0 }
 0x191   :  { %515 = vmatmul.mubr.msk.f32.vlgmr.msra.gmra.mxu1 %vm249_vm4, %v323_v33 }
 0x251   :  { %v408_v35 = vpop.f32.mrf.mxu1 }
 0x252   :  { %v409_v36 = vadd.f32 %v444_v34, %v408_v35 }
 0x253   :  { %v516_v37 = vpop.f32.mrf.mxu1 }
 0x254   :  { %412 = vst.msk [vmem:[#allocation4] sm:$0xff] %vm151_vm2, %v409_v36 }
 0x255   :  { %531 = shalt.err (!%p528_p5)
}
 0x256   :  { %422 = dma.vmem_to_hbm [thread:$0]  %s420_s22, 128, %s707_s10, [#allocation5]  }
 0x257   :  { %540 = dma.done.wait [#allocation5], 128  }
 0x258   :  { %541 = vsyncadd [#allocation5], 4294967168 }
 0x259   :  { %426 = vsyncpa [#allocation5], 1 }

</bundles_post_ra>
